<compile_context>
chip_gen: v7x
topology: tpu7x:2x2x1
jax: 0.10.0
libtpu: 0.0.40
codegen_flags: <defaults>
</compile_context>

<pallas_src>
import functools

import jax
import jax.numpy as jnp
import numpy as np
from jax import lax
from jax.experimental import pallas as pl
from jax.experimental.pallas import tpu as pltpu


def _weights_lib_2d_beta_kernel(mod_ref, base_ref, o_ref, *, eps, tb, compute_dtype):
    """One grid step computes `tb` batch rows of one [TH, W] spatial tile.

    Grid is (H // TH, B // tb): axis 0 = H tile (outer, parallel),
    axis 1 = batch block (inner, arbitrary).

    mod_ref : SMEM [B, 12] f32 -- per-row modulation scalars, shifts pre-folded.
    base_ref: VMEM [8, TH, W] bf16 -- planes 0..3 = z1 (k0r,k0i,k1r,k1i),
                                      planes 4..7 = dz = z2 - z1 (same order).
    o_ref   : VMEM [tb, TH, W]     -- output block for this grid step.
    """
    cdt = compute_dtype
    f32 = jnp.float32
    eps_f = jnp.asarray(eps, f32)
    b0 = pl.program_id(1) * tb  # batch axis is the INNER grid dimension

    # Batch-independent planes for this H tile: load/cast once, reuse per row.
    z1 = [[base_ref[k * 2 + c].astype(cdt) for c in range(2)] for k in range(2)]
    dz = [[base_ref[4 + k * 2 + c].astype(cdt) for c in range(2)] for k in range(2)]

    # tb is capped small (<= 8) by the wrapper, so a static unroll keeps the
    # per-row live set in vregs without blowing up register pressure.
    for bl in range(tb):
        b = b0 + bl

        wr, wi = [], []
        for k in range(2):
            # Scalar splats straight from SMEM; constant shifts already folded.
            lr = mod_ref[b, k * 2 + 0].astype(cdt)
            li = mod_ref[b, k * 2 + 1].astype(cdt)
            br = mod_ref[b, 4 + k * 2 + 0].astype(cdt)
            bi = mod_ref[b, 4 + k * 2 + 1].astype(cdt)
            sr = mod_ref[b, 8 + k * 2 + 0].astype(cdt)
            si = mod_ref[b, 8 + k * 2 + 1].astype(cdt)

            z1r, z1i = z1[k]
            dzr, dzi = dz[k]

            # Complex lerp in delta form: y = z1 + l * (z2 - z1)
            yr = z1r + lr * dzr - li * dzi
            yi = z1i + lr * dzi + li * dzr

            # addmul(y, param_s, param_b): complex multiply + bias
            wr.append(br + (yr * sr - yi * si))
            wi.append(bi + (yr * si + yi * sr))

        # Normalize channel 1, project channel 0 onto it (real part of the
        # complex dot).  Denominator / rsqrt / projection in f32 for accuracy;
        # one EUP rsqrt + one mul instead of sqrt + 2 divides.
        w0r, w0i = wr[0].astype(f32), wi[0].astype(f32)
        w1r, w1i = wr[1].astype(f32), wi[1].astype(f32)
        inv = lax.rsqrt(w1r * w1r + w1i * w1i + eps_f)
        out = (w0r * w1r + w0i * w1i) * inv
        o_ref[bl] = out.astype(o_ref.dtype)


def _default_compute_dtype():
    """bf16 elementwise math on chips with a bf16 VALU (v6e/v7x); f32 otherwise."""
    try:
        kind = jax.devices()[0].device_kind.lower()
    except Exception:  # pragma: no cover
        return jnp.float32
    if any(tag in kind for tag in ("v6", "v7", "7x")):
        return jnp.bfloat16
    return jnp.float32


def _vmem_bytes(tb, th, w_pad, out_bytes, compute_bytes):
    base = 8 * th * w_pad * 2                 # bf16 base planes, single-buffered
    outb = 2 * tb * th * w_pad * out_bytes    # double-buffered output blocks
    tmp = 16 * th * w_pad * compute_bytes     # plane casts + live per-row temporaries
    return base + outb + tmp


def _choose_tiles(B, H, w_pad, out_bytes, compute_bytes, vmem_budget=20 << 20):
    # Batch block: <= 8 rows per step bounds register pressure of the static
    # row unroll while still amortizing the ~0.35us/step overhead.
    tb = max(d for d in range(1, min(B, 8) + 1) if B % d == 0)

    def fits(th):
        return _vmem_bytes(tb, th, w_pad, out_bytes, compute_bytes) <= vmem_budget

    if fits(H):
        return tb, H
    # Divisors of H that are multiples of 16 keep both the bf16 base block
    # (16,128 tiling) and the output block (8,128 tiling) aligned.
    cands = [d for d in range(16, H, 16) if H % d == 0 and fits(d)]
    if cands:
        return tb, max(cands)
    # No fitting aligned divisor: take the smallest aligned divisor (or full H).
    # TODO(synk): for pathological H with no multiple-of-16 divisor and very
    # large W, additionally tile W in multiples of 128.
    small = [d for d in range(16, H, 16) if H % d == 0]
    return tb, (min(small) if small else H)


def prepare_params(params, lane_multiple=128):
    """One-time parameter repack, hoisted out of the per-call forward.

    Returns the 8 base planes in [8, H, W_pad] layout (z1 planes then
    dz = z2 - z1 planes), W padded to a lane multiple, plus the fused context
    transform weights [L, 24] / [24].
    """
    base = params["weights"][0].astype(jnp.float32)        # [2, 2, H, W, 2]
    H, W = base.shape[2], base.shape[3]
    w_pad = ((W + lane_multiple - 1) // lane_multiple) * lane_multiple
    z1 = base[0]                                           # [2, H, W, 2]
    dz = base[1] - base[0]                                 # [2, H, W, 2]
    planes = jnp.concatenate([z1, dz], axis=0)             # [4, H, W, 2]
    planes = jnp.transpose(planes, (0, 3, 1, 2)).reshape(8, H, W)
    if w_pad != W:
        planes = jnp.pad(planes, ((0, 0), (0, 0), (0, w_pad - W)))
    w_cat = jnp.concatenate([params["w_in"], params["w_gate"]], axis=1)   # [L, 24]
    b_cat = jnp.concatenate([params["b_in"], params["b_gate"]], axis=0)   # [24]
    return dict(planes=planes.astype(jnp.bfloat16), w_cat=w_cat, b_cat=b_cat,
                H=H, W=W, W_pad=w_pad)


# Constant shifts of the original module (+0.5 on Re(param_l), +1.0 on
# Re(param_s)), folded into the mod tensor once in the wrapper.
_MOD_SHIFT = np.zeros((12,), np.float32)
_MOD_SHIFT[[0, 2]] = 0.5    # Re(l_k)
_MOD_SHIFT[[8, 10]] = 1.0   # Re(s_k)


def weights_lib_2d_beta_forward(x, prepared, output_shape, eps=1e-12,
                                out_dtype=None, compute_dtype=None):
    B, _ = x.shape
    H, W = output_shape
    w_pad = prepared["W_pad"]
    out_dtype = x.dtype if out_dtype is None else out_dtype
    compute_dtype = _default_compute_dtype() if compute_dtype is None else compute_dtype
    out_bytes = jnp.dtype(out_dtype).itemsize
    compute_bytes = jnp.dtype(compute_dtype).itemsize

    # Fused context transform in plain XLA (a (B,L)x(L,24) matmul is far too
    # small for an in-kernel MXU push); kernel only sees mod=[B,12] scalars.
    xb = x.astype(jnp.bfloat16)
    tg = jnp.dot(xb, prepared["w_cat"], preferred_element_type=jnp.float32)
    tg = tg + prepared["b_cat"].astype(jnp.float32)
    t = tg[:, :12].astype(jnp.bfloat16)
    g = tg[:, 12:].astype(jnp.bfloat16)
    mod = (t * jnp.tanh(g)).astype(jnp.float32) + jnp.asarray(_MOD_SHIFT)   # [B, 12]

    tb, th = _choose_tiles(B, H, w_pad, out_bytes, compute_bytes)
    n_h, n_b = H // th, B // tb

    # Only raise the scoped VMEM limit when the per-step requirement exceeds
    # the 32 MiB default; cap at 48 MiB to leave compiler scratch headroom on
    # v7x (64 MiB physical per TensorCore).
    req = _vmem_bytes(tb, th, w_pad, out_bytes, compute_bytes)
    vmem_limit = None if req <= (28 << 20) else min(req + (4 << 20), 48 << 20)

    out = pl.pallas_call(
        functools.partial(_weights_lib_2d_beta_kernel, eps=eps, tb=tb,
                          compute_dtype=compute_dtype),
        out_shape=jax.ShapeDtypeStruct((B, H, w_pad), out_dtype),
        grid=(n_h, n_b),   # H tiles outermost, batch blocks innermost
        in_specs=[
            # per-row modulation scalars: whole array resident in SMEM
            pl.BlockSpec(memory_space=pltpu.MemorySpace.SMEM),
            # base planes: block index depends only on the (outer) H-tile axis,
            # so each tile is DMA'd once; single-buffered (fetched once per tile).
            pl.BlockSpec((8, th, w_pad), lambda h, b: (0, h, 0),
                         pipeline_mode=pl.Buffered(1)),
        ],
        out_specs=pl.BlockSpec((tb, th, w_pad), lambda h, b: (b, h, 0)),
        compiler_params=pltpu.CompilerParams(
            dimension_semantics=("parallel", "arbitrary"),
            vmem_limit_bytes=vmem_limit,
        ),
    )(mod, prepared["planes"])

    if w_pad != W:
        out = out[:, :, :W]
    return out


def init_params(key, output_shape, context_length, std=0.01, dtype=jnp.bfloat16):
    H, W = output_shape
    k1, k2, k3, k4, k5 = jax.random.split(key, 5)
    bound = 1.0 / np.sqrt(context_length)
    w_in = jax.random.uniform(k1, (context_length, 12), jnp.float32, -bound, bound).astype(dtype)
    b_in = jax.random.uniform(k2, (12,), jnp.float32, -bound, bound).astype(dtype)
    w_gate = jax.random.uniform(k3, (context_length, 12), jnp.float32, -bound, bound).astype(dtype)
    b_gate = jax.random.uniform(k4, (12,), jnp.float32, -bound, bound).astype(dtype)
    weights = (std * jax.random.normal(k5, (1, 2, 2, H, W, 2), jnp.float32)).astype(dtype)
    return dict(w_in=w_in, b_in=b_in, w_gate=w_gate, b_gate=b_gate, weights=weights)


def reference_forward(x, params, output_shape, eps=1e-12):
    """Pure-JAX replica of the PyTorch forward (bf16 compute, original op order)."""
    dt = jnp.bfloat16
    in_dtype = x.dtype
    B = x.shape[0]
    H, W = output_shape
    xb = x.astype(dt)
    t = jnp.dot(xb, params["w_in"], preferred_element_type=jnp.float32)
    t = t + params["b_in"].astype(jnp.float32)
    g = jnp.dot(xb, params["w_gate"], preferred_element_type=jnp.float32)
    g = g + params["b_gate"].astype(jnp.float32)
    mod = t.astype(dt) * jnp.tanh(g.astype(dt))
    mod = jnp.broadcast_to(mod.reshape(B, 3, 2, 1, 1, 2), (B, 3, 2, H, W, 2))
    shift_lerp = jnp.array([0.5, 0.0], dt).reshape(1, 1, 1, 2)
    shift_scale = jnp.array([1.0, 0.0], dt).reshape(1, 1, 1, 2)
    param_l = mod[:, 0] + shift_lerp
    param_b = mod[:, 1]
    param_s = mod[:, 2] + shift_scale
    w = jnp.broadcast_to(params["weights"], (B, 2, 2, H, W, 2))
    z1, z2, c = w[:, 0], w[:, 1], param_l
    lerped = jnp.stack([
        (1 - c[..., 0]) * z1[..., 0] + c[..., 0] * z2[..., 0] - c[..., 1] * (z2[..., 1] - z1[..., 1]),
        (1 - c[..., 0]) * z1[..., 1] + c[..., 0] * z2[..., 1] + c[..., 1] * (z2[..., 0] - z1[..., 0]),
    ], axis=-1)
    w2 = jnp.stack([
        param_b[..., 0] + (lerped[..., 0] * param_s[..., 0] - lerped[..., 1] * param_s[..., 1]),
        param_b[..., 1] + (lerped[..., 0] * param_s[..., 1] + lerped[..., 1] * param_s[..., 0]),
    ], axis=-1)
    denom = jnp.sqrt((w2[:, 1] ** 2).sum(-1) + jnp.asarray(eps, dt))[..., None]
    theta = w2[:, 1] / denom
    out = (w2[:, 0] * theta).sum(-1)
    return out.astype(in_dtype)


if __name__ == "__main__":
    B, L = 4, 8          # batch, context_length
    H, W = 16, 128       # output_shape (lane-aligned last dim)
    eps = 1e-12

    key = jax.random.PRNGKey(0)
    kp, kx = jax.random.split(key)
    params = init_params(kp, (H, W), L)
    x = jax.random.normal(kx, (B, L), jnp.float32)

    prepared = prepare_params(params)   # one-time repack (not per forward)
    out = weights_lib_2d_beta_forward(x, prepared, (H, W), eps=eps)
    out = jax.block_until_ready(out)

    assert out.shape == (B, H, W), out.shape
    assert out.dtype == x.dtype, out.dtype

    ref = reference_forward(x, params, (H, W), eps=eps)
    np.testing.assert_allclose(np.asarray(out), np.asarray(ref),
                               rtol=5e-2, atol=5e-2)
    print("KERNEL_OK")
</pallas_src>

<mosaic_0001>
module attributes {stable_mosaic.version = 11 : i64} {
  func.func @_weights_lib_2d_beta_kernel(%arg0: i32, %arg1: i32, %arg2: memref<4x12xf32, #tpu.memory_space<smem>>, %arg3: memref<8x16x128xbf16, #tpu.memory_space<vmem>>, %arg4: memref<4x16x128xf32, #tpu.memory_space<vmem>>) attributes {dimension_semantics = [#tpu.dimension_semantics<parallel>, #tpu.dimension_semantics<arbitrary>], iteration_bounds = array<i64: 1, 1>, scalar_prefetch = 0 : i64, scratch_operands = 0 : i64, tpu.core_type = #tpu.core_type<tc>, window_params = [{transform_indices = @transform_0, window_bounds = array<i64: 4, 12>}, {pipeline_mode = #tpu.pipeline_mode<synchronous>, transform_indices = @transform_1, window_bounds = array<i64: 8, 16, 128>}, {transform_indices = @transform_2, window_bounds = array<i64: 4, 16, 128>}]} {
    %c4_i32 = arith.constant 4 : i32
    %0 = arith.muli %arg1, %c4_i32 : i32
    %c0 = arith.constant 0 : index
    %c0_0 = arith.constant 0 : index
    %c0_1 = arith.constant 0 : index
    %1 = vector.load %arg3[%c0, %c0_0, %c0_1] : memref<8x16x128xbf16, #tpu.memory_space<vmem>>, vector<1x16x128xbf16>
    %2 = vector.shape_cast %1 : vector<1x16x128xbf16> to vector<16x128xbf16>
    %3 = arith.extf %2 : vector<16x128xbf16> to vector<16x128xf32>
    %c1 = arith.constant 1 : index
    %c0_2 = arith.constant 0 : index
    %c0_3 = arith.constant 0 : index
    %4 = vector.load %arg3[%c1, %c0_2, %c0_3] : memref<8x16x128xbf16, #tpu.memory_space<vmem>>, vector<1x16x128xbf16>
    %5 = vector.shape_cast %4 : vector<1x16x128xbf16> to vector<16x128xbf16>
    %6 = arith.extf %5 : vector<16x128xbf16> to vector<16x128xf32>
    %c2 = arith.constant 2 : index
    %c0_4 = arith.constant 0 : index
    %c0_5 = arith.constant 0 : index
    %7 = vector.load %arg3[%c2, %c0_4, %c0_5] : memref<8x16x128xbf16, #tpu.memory_space<vmem>>, vector<1x16x128xbf16>
    %8 = vector.shape_cast %7 : vector<1x16x128xbf16> to vector<16x128xbf16>
    %9 = arith.extf %8 : vector<16x128xbf16> to vector<16x128xf32>
    %c3 = arith.constant 3 : index
    %c0_6 = arith.constant 0 : index
    %c0_7 = arith.constant 0 : index
    %10 = vector.load %arg3[%c3, %c0_6, %c0_7] : memref<8x16x128xbf16, #tpu.memory_space<vmem>>, vector<1x16x128xbf16>
    %11 = vector.shape_cast %10 : vector<1x16x128xbf16> to vector<16x128xbf16>
    %12 = arith.extf %11 : vector<16x128xbf16> to vector<16x128xf32>
    %c4 = arith.constant 4 : index
    %c0_8 = arith.constant 0 : index
    %c0_9 = arith.constant 0 : index
    %13 = vector.load %arg3[%c4, %c0_8, %c0_9] : memref<8x16x128xbf16, #tpu.memory_space<vmem>>, vector<1x16x128xbf16>
    %14 = vector.shape_cast %13 : vector<1x16x128xbf16> to vector<16x128xbf16>
    %15 = arith.extf %14 : vector<16x128xbf16> to vector<16x128xf32>
    %c5 = arith.constant 5 : index
    %c0_10 = arith.constant 0 : index
    %c0_11 = arith.constant 0 : index
    %16 = vector.load %arg3[%c5, %c0_10, %c0_11] : memref<8x16x128xbf16, #tpu.memory_space<vmem>>, vector<1x16x128xbf16>
    %17 = vector.shape_cast %16 : vector<1x16x128xbf16> to vector<16x128xbf16>
    %18 = arith.extf %17 : vector<16x128xbf16> to vector<16x128xf32>
    %c6 = arith.constant 6 : index
    %c0_12 = arith.constant 0 : index
    %c0_13 = arith.constant 0 : index
    %19 = vector.load %arg3[%c6, %c0_12, %c0_13] : memref<8x16x128xbf16, #tpu.memory_space<vmem>>, vector<1x16x128xbf16>
    %20 = vector.shape_cast %19 : vector<1x16x128xbf16> to vector<16x128xbf16>
    %21 = arith.extf %20 : vector<16x128xbf16> to vector<16x128xf32>
    %c7 = arith.constant 7 : index
    %c0_14 = arith.constant 0 : index
    %c0_15 = arith.constant 0 : index
    %22 = vector.load %arg3[%c7, %c0_14, %c0_15] : memref<8x16x128xbf16, #tpu.memory_space<vmem>>, vector<1x16x128xbf16>
    %23 = vector.shape_cast %22 : vector<1x16x128xbf16> to vector<16x128xbf16>
    %24 = arith.extf %23 : vector<16x128xbf16> to vector<16x128xf32>
    %c0_i32 = arith.constant 0 : i32
    %25 = arith.addi %0, %c0_i32 : i32
    %26 = arith.index_cast %25 : i32 to index
    %c0_16 = arith.constant 0 : index
    %27 = memref.load %arg2[%26, %c0_16] : memref<4x12xf32, #tpu.memory_space<smem>>
    %28 = arith.index_cast %25 : i32 to index
    %c1_17 = arith.constant 1 : index
    %29 = memref.load %arg2[%28, %c1_17] : memref<4x12xf32, #tpu.memory_space<smem>>
    %30 = arith.index_cast %25 : i32 to index
    %c4_18 = arith.constant 4 : index
    %31 = memref.load %arg2[%30, %c4_18] : memref<4x12xf32, #tpu.memory_space<smem>>
    %32 = arith.index_cast %25 : i32 to index
    %c5_19 = arith.constant 5 : index
    %33 = memref.load %arg2[%32, %c5_19] : memref<4x12xf32, #tpu.memory_space<smem>>
    %34 = arith.index_cast %25 : i32 to index
    %c8 = arith.constant 8 : index
    %35 = memref.load %arg2[%34, %c8] : memref<4x12xf32, #tpu.memory_space<smem>>
    %36 = arith.index_cast %25 : i32 to index
    %c9 = arith.constant 9 : index
    %37 = memref.load %arg2[%36, %c9] : memref<4x12xf32, #tpu.memory_space<smem>>
    %38 = vector.broadcast %27 : f32 to vector<16x128xf32>
    %39 = arith.mulf %38, %15 : vector<16x128xf32>
    %40 = arith.addf %3, %39 : vector<16x128xf32>
    %41 = vector.broadcast %29 : f32 to vector<16x128xf32>
    %42 = arith.mulf %41, %18 : vector<16x128xf32>
    %43 = arith.subf %40, %42 : vector<16x128xf32>
    %44 = vector.broadcast %27 : f32 to vector<16x128xf32>
    %45 = arith.mulf %44, %18 : vector<16x128xf32>
    %46 = arith.addf %6, %45 : vector<16x128xf32>
    %47 = vector.broadcast %29 : f32 to vector<16x128xf32>
    %48 = arith.mulf %47, %15 : vector<16x128xf32>
    %49 = arith.addf %46, %48 : vector<16x128xf32>
    %50 = vector.broadcast %35 : f32 to vector<16x128xf32>
    %51 = arith.mulf %43, %50 : vector<16x128xf32>
    %52 = vector.broadcast %37 : f32 to vector<16x128xf32>
    %53 = arith.mulf %49, %52 : vector<16x128xf32>
    %54 = arith.subf %51, %53 : vector<16x128xf32>
    %55 = vector.broadcast %31 : f32 to vector<16x128xf32>
    %56 = arith.addf %55, %54 : vector<16x128xf32>
    %57 = vector.broadcast %37 : f32 to vector<16x128xf32>
    %58 = arith.mulf %43, %57 : vector<16x128xf32>
    %59 = vector.broadcast %35 : f32 to vector<16x128xf32>
    %60 = arith.mulf %49, %59 : vector<16x128xf32>
    %61 = arith.addf %58, %60 : vector<16x128xf32>
    %62 = vector.broadcast %33 : f32 to vector<16x128xf32>
    %63 = arith.addf %62, %61 : vector<16x128xf32>
    %64 = arith.index_cast %25 : i32 to index
    %c2_20 = arith.constant 2 : index
    %65 = memref.load %arg2[%64, %c2_20] : memref<4x12xf32, #tpu.memory_space<smem>>
    %66 = arith.index_cast %25 : i32 to index
    %c3_21 = arith.constant 3 : index
    %67 = memref.load %arg2[%66, %c3_21] : memref<4x12xf32, #tpu.memory_space<smem>>
    %68 = arith.index_cast %25 : i32 to index
    %c6_22 = arith.constant 6 : index
    %69 = memref.load %arg2[%68, %c6_22] : memref<4x12xf32, #tpu.memory_space<smem>>
    %70 = arith.index_cast %25 : i32 to index
    %c7_23 = arith.constant 7 : index
    %71 = memref.load %arg2[%70, %c7_23] : memref<4x12xf32, #tpu.memory_space<smem>>
    %72 = arith.index_cast %25 : i32 to index
    %c10 = arith.constant 10 : index
    %73 = memref.load %arg2[%72, %c10] : memref<4x12xf32, #tpu.memory_space<smem>>
    %74 = arith.index_cast %25 : i32 to index
    %c11 = arith.constant 11 : index
    %75 = memref.load %arg2[%74, %c11] : memref<4x12xf32, #tpu.memory_space<smem>>
    %76 = vector.broadcast %65 : f32 to vector<16x128xf32>
    %77 = arith.mulf %76, %21 : vector<16x128xf32>
    %78 = arith.addf %9, %77 : vector<16x128xf32>
    %79 = vector.broadcast %67 : f32 to vector<16x128xf32>
    %80 = arith.mulf %79, %24 : vector<16x128xf32>
    %81 = arith.subf %78, %80 : vector<16x128xf32>
    %82 = vector.broadcast %65 : f32 to vector<16x128xf32>
    %83 = arith.mulf %82, %24 : vector<16x128xf32>
    %84 = arith.addf %12, %83 : vector<16x128xf32>
    %85 = vector.broadcast %67 : f32 to vector<16x128xf32>
    %86 = arith.mulf %85, %21 : vector<16x128xf32>
    %87 = arith.addf %84, %86 : vector<16x128xf32>
    %88 = vector.broadcast %73 : f32 to vector<16x128xf32>
    %89 = arith.mulf %81, %88 : vector<16x128xf32>
    %90 = vector.broadcast %75 : f32 to vector<16x128xf32>
    %91 = arith.mulf %87, %90 : vector<16x128xf32>
    %92 = arith.subf %89, %91 : vector<16x128xf32>
    %93 = vector.broadcast %69 : f32 to vector<16x128xf32>
    %94 = arith.addf %93, %92 : vector<16x128xf32>
    %95 = vector.broadcast %75 : f32 to vector<16x128xf32>
    %96 = arith.mulf %81, %95 : vector<16x128xf32>
    %97 = vector.broadcast %73 : f32 to vector<16x128xf32>
    %98 = arith.mulf %87, %97 : vector<16x128xf32>
    %99 = arith.addf %96, %98 : vector<16x128xf32>
    %100 = vector.broadcast %71 : f32 to vector<16x128xf32>
    %101 = arith.addf %100, %99 : vector<16x128xf32>
    %102 = arith.mulf %94, %94 : vector<16x128xf32>
    %103 = arith.mulf %101, %101 : vector<16x128xf32>
    %104 = arith.addf %102, %103 : vector<16x128xf32>
    %cst = arith.constant 9.99999996E-13 : f32
    %105 = vector.broadcast %cst : f32 to vector<16x128xf32>
    %106 = arith.addf %104, %105 : vector<16x128xf32>
    %107 = math.rsqrt %106 : vector<16x128xf32>
    %108 = arith.mulf %56, %94 : vector<16x128xf32>
    %109 = arith.mulf %63, %101 : vector<16x128xf32>
    %110 = arith.addf %108, %109 : vector<16x128xf32>
    %111 = arith.mulf %110, %107 : vector<16x128xf32>
    %c0_24 = arith.constant 0 : index
    %c0_25 = arith.constant 0 : index
    %c0_26 = arith.constant 0 : index
    %112 = vector.load %arg4[%c0_24, %c0_25, %c0_26] : memref<4x16x128xf32, #tpu.memory_space<vmem>>, vector<1x16x128xf32>
    %113 = vector.shape_cast %112 : vector<1x16x128xf32> to vector<16x128xf32>
    %114 = vector.shape_cast %111 : vector<16x128xf32> to vector<1x16x128xf32>
    tpu.vector_store %arg4[%c0_24, %c0_25, %c0_26], %114 {strides = array<i32>} : memref<4x16x128xf32, #tpu.memory_space<vmem>>, vector<1x16x128xf32>,
    %c1_i32 = arith.constant 1 : i32
    %115 = arith.addi %0, %c1_i32 : i32
    %116 = arith.index_cast %115 : i32 to index
    %c0_27 = arith.constant 0 : index
    %117 = memref.load %arg2[%116, %c0_27] : memref<4x12xf32, #tpu.memory_space<smem>>
    %118 = arith.index_cast %115 : i32 to index
    %c1_28 = arith.constant 1 : index
    %119 = memref.load %arg2[%118, %c1_28] : memref<4x12xf32, #tpu.memory_space<smem>>
    %120 = arith.index_cast %115 : i32 to index
    %c4_29 = arith.constant 4 : index
    %121 = memref.load %arg2[%120, %c4_29] : memref<4x12xf32, #tpu.memory_space<smem>>
    %122 = arith.index_cast %115 : i32 to index
    %c5_30 = arith.constant 5 : index
    %123 = memref.load %arg2[%122, %c5_30] : memref<4x12xf32, #tpu.memory_space<smem>>
    %124 = arith.index_cast %115 : i32 to index
    %c8_31 = arith.constant 8 : index
    %125 = memref.load %arg2[%124, %c8_31] : memref<4x12xf32, #tpu.memory_space<smem>>
    %126 = arith.index_cast %115 : i32 to index
    %c9_32 = arith.constant 9 : index
    %127 = memref.load %arg2[%126, %c9_32] : memref<4x12xf32, #tpu.memory_space<smem>>
    %128 = vector.broadcast %117 : f32 to vector<16x128xf32>
    %129 = arith.mulf %128, %15 : vector<16x128xf32>
    %130 = arith.addf %3, %129 : vector<16x128xf32>
    %131 = vector.broadcast %119 : f32 to vector<16x128xf32>
    %132 = arith.mulf %131, %18 : vector<16x128xf32>
    %133 = arith.subf %130, %132 : vector<16x128xf32>
    %134 = vector.broadcast %117 : f32 to vector<16x128xf32>
    %135 = arith.mulf %134, %18 : vector<16x128xf32>
    %136 = arith.addf %6, %135 : vector<16x128xf32>
    %137 = vector.broadcast %119 : f32 to vector<16x128xf32>
    %138 = arith.mulf %137, %15 : vector<16x128xf32>
    %139 = arith.addf %136, %138 : vector<16x128xf32>
    %140 = vector.broadcast %125 : f32 to vector<16x128xf32>
    %141 = arith.mulf %133, %140 : vector<16x128xf32>
    %142 = vector.broadcast %127 : f32 to vector<16x128xf32>
    %143 = arith.mulf %139, %142 : vector<16x128xf32>
    %144 = arith.subf %141, %143 : vector<16x128xf32>
    %145 = vector.broadcast %121 : f32 to vector<16x128xf32>
    %146 = arith.addf %145, %144 : vector<16x128xf32>
    %147 = vector.broadcast %127 : f32 to vector<16x128xf32>
    %148 = arith.mulf %133, %147 : vector<16x128xf32>
    %149 = vector.broadcast %125 : f32 to vector<16x128xf32>
    %150 = arith.mulf %139, %149 : vector<16x128xf32>
    %151 = arith.addf %148, %150 : vector<16x128xf32>
    %152 = vector.broadcast %123 : f32 to vector<16x128xf32>
    %153 = arith.addf %152, %151 : vector<16x128xf32>
    %154 = arith.index_cast %115 : i32 to index
    %c2_33 = arith.constant 2 : index
    %155 = memref.load %arg2[%154, %c2_33] : memref<4x12xf32, #tpu.memory_space<smem>>
    %156 = arith.index_cast %115 : i32 to index
    %c3_34 = arith.constant 3 : index
    %157 = memref.load %arg2[%156, %c3_34] : memref<4x12xf32, #tpu.memory_space<smem>>
    %158 = arith.index_cast %115 : i32 to index
    %c6_35 = arith.constant 6 : index
    %159 = memref.load %arg2[%158, %c6_35] : memref<4x12xf32, #tpu.memory_space<smem>>
    %160 = arith.index_cast %115 : i32 to index
    %c7_36 = arith.constant 7 : index
    %161 = memref.load %arg2[%160, %c7_36] : memref<4x12xf32, #tpu.memory_space<smem>>
    %162 = arith.index_cast %115 : i32 to index
    %c10_37 = arith.constant 10 : index
    %163 = memref.load %arg2[%162, %c10_37] : memref<4x12xf32, #tpu.memory_space<smem>>
    %164 = arith.index_cast %115 : i32 to index
    %c11_38 = arith.constant 11 : index
    %165 = memref.load %arg2[%164, %c11_38] : memref<4x12xf32, #tpu.memory_space<smem>>
    %166 = vector.broadcast %155 : f32 to vector<16x128xf32>
    %167 = arith.mulf %166, %21 : vector<16x128xf32>
    %168 = arith.addf %9, %167 : vector<16x128xf32>
    %169 = vector.broadcast %157 : f32 to vector<16x128xf32>
    %170 = arith.mulf %169, %24 : vector<16x128xf32>
    %171 = arith.subf %168, %170 : vector<16x128xf32>
    %172 = vector.broadcast %155 : f32 to vector<16x128xf32>
    %173 = arith.mulf %172, %24 : vector<16x128xf32>
    %174 = arith.addf %12, %173 : vector<16x128xf32>
    %175 = vector.broadcast %157 : f32 to vector<16x128xf32>
    %176 = arith.mulf %175, %21 : vector<16x128xf32>
    %177 = arith.addf %174, %176 : vector<16x128xf32>
    %178 = vector.broadcast %163 : f32 to vector<16x128xf32>
    %179 = arith.mulf %171, %178 : vector<16x128xf32>
    %180 = vector.broadcast %165 : f32 to vector<16x128xf32>
    %181 = arith.mulf %177, %180 : vector<16x128xf32>
    %182 = arith.subf %179, %181 : vector<16x128xf32>
    %183 = vector.broadcast %159 : f32 to vector<16x128xf32>
    %184 = arith.addf %183, %182 : vector<16x128xf32>
    %185 = vector.broadcast %165 : f32 to vector<16x128xf32>
    %186 = arith.mulf %171, %185 : vector<16x128xf32>
    %187 = vector.broadcast %163 : f32 to vector<16x128xf32>
    %188 = arith.mulf %177, %187 : vector<16x128xf32>
    %189 = arith.addf %186, %188 : vector<16x128xf32>
    %190 = vector.broadcast %161 : f32 to vector<16x128xf32>
    %191 = arith.addf %190, %189 : vector<16x128xf32>
    %192 = arith.mulf %184, %184 : vector<16x128xf32>
    %193 = arith.mulf %191, %191 : vector<16x128xf32>
    %194 = arith.addf %192, %193 : vector<16x128xf32>
    %cst_39 = arith.constant 9.99999996E-13 : f32
    %195 = vector.broadcast %cst_39 : f32 to vector<16x128xf32>
    %196 = arith.addf %194, %195 : vector<16x128xf32>
    %197 = math.rsqrt %196 : vector<16x128xf32>
    %198 = arith.mulf %146, %184 : vector<16x128xf32>
    %199 = arith.mulf %153, %191 : vector<16x128xf32>
    %200 = arith.addf %198, %199 : vector<16x128xf32>
    %201 = arith.mulf %200, %197 : vector<16x128xf32>
    %c1_40 = arith.constant 1 : index
    %c0_41 = arith.constant 0 : index
    %c0_42 = arith.constant 0 : index
    %202 = vector.load %arg4[%c1_40, %c0_41, %c0_42] : memref<4x16x128xf32, #tpu.memory_space<vmem>>, vector<1x16x128xf32>
    %203 = vector.shape_cast %202 : vector<1x16x128xf32> to vector<16x128xf32>
    %204 = vector.shape_cast %201 : vector<16x128xf32> to vector<1x16x128xf32>
    tpu.vector_store %arg4[%c1_40, %c0_41, %c0_42], %204 {strides = array<i32>} : memref<4x16x128xf32, #tpu.memory_space<vmem>>, vector<1x16x128xf32>,
    %c2_i32 = arith.constant 2 : i32
    %205 = arith.addi %0, %c2_i32 : i32
    %206 = arith.index_cast %205 : i32 to index
    %c0_43 = arith.constant 0 : index
    %207 = memref.load %arg2[%206, %c0_43] : memref<4x12xf32, #tpu.memory_space<smem>>
    %208 = arith.index_cast %205 : i32 to index
    %c1_44 = arith.constant 1 : index
    %209 = memref.load %arg2[%208, %c1_44] : memref<4x12xf32, #tpu.memory_space<smem>>
    %210 = arith.index_cast %205 : i32 to index
    %c4_45 = arith.constant 4 : index
    %211 = memref.load %arg2[%210, %c4_45] : memref<4x12xf32, #tpu.memory_space<smem>>
    %212 = arith.index_cast %205 : i32 to index
    %c5_46 = arith.constant 5 : index
    %213 = memref.load %arg2[%212, %c5_46] : memref<4x12xf32, #tpu.memory_space<smem>>
    %214 = arith.index_cast %205 : i32 to index
    %c8_47 = arith.constant 8 : index
    %215 = memref.load %arg2[%214, %c8_47] : memref<4x12xf32, #tpu.memory_space<smem>>
    %216 = arith.index_cast %205 : i32 to index
    %c9_48 = arith.constant 9 : index
    %217 = memref.load %arg2[%216, %c9_48] : memref<4x12xf32, #tpu.memory_space<smem>>
    %218 = vector.broadcast %207 : f32 to vector<16x128xf32>
    %219 = arith.mulf %218, %15 : vector<16x128xf32>
    %220 = arith.addf %3, %219 : vector<16x128xf32>
    %221 = vector.broadcast %209 : f32 to vector<16x128xf32>
    %222 = arith.mulf %221, %18 : vector<16x128xf32>
    %223 = arith.subf %220, %222 : vector<16x128xf32>
    %224 = vector.broadcast %207 : f32 to vector<16x128xf32>
    %225 = arith.mulf %224, %18 : vector<16x128xf32>
    %226 = arith.addf %6, %225 : vector<16x128xf32>
    %227 = vector.broadcast %209 : f32 to vector<16x128xf32>
    %228 = arith.mulf %227, %15 : vector<16x128xf32>
    %229 = arith.addf %226, %228 : vector<16x128xf32>
    %230 = vector.broadcast %215 : f32 to vector<16x128xf32>
    %231 = arith.mulf %223, %230 : vector<16x128xf32>
    %232 = vector.broadcast %217 : f32 to vector<16x128xf32>
    %233 = arith.mulf %229, %232 : vector<16x128xf32>
    %234 = arith.subf %231, %233 : vector<16x128xf32>
    %235 = vector.broadcast %211 : f32 to vector<16x128xf32>
    %236 = arith.addf %235, %234 : vector<16x128xf32>
    %237 = vector.broadcast %217 : f32 to vector<16x128xf32>
    %238 = arith.mulf %223, %237 : vector<16x128xf32>
    %239 = vector.broadcast %215 : f32 to vector<16x128xf32>
    %240 = arith.mulf %229, %239 : vector<16x128xf32>
    %241 = arith.addf %238, %240 : vector<16x128xf32>
    %242 = vector.broadcast %213 : f32 to vector<16x128xf32>
    %243 = arith.addf %242, %241 : vector<16x128xf32>
    %244 = arith.index_cast %205 : i32 to index
    %c2_49 = arith.constant 2 : index
    %245 = memref.load %arg2[%244, %c2_49] : memref<4x12xf32, #tpu.memory_space<smem>>
    %246 = arith.index_cast %205 : i32 to index
    %c3_50 = arith.constant 3 : index
    %247 = memref.load %arg2[%246, %c3_50] : memref<4x12xf32, #tpu.memory_space<smem>>
    %248 = arith.index_cast %205 : i32 to index
    %c6_51 = arith.constant 6 : index
    %249 = memref.load %arg2[%248, %c6_51] : memref<4x12xf32, #tpu.memory_space<smem>>
    %250 = arith.index_cast %205 : i32 to index
    %c7_52 = arith.constant 7 : index
    %251 = memref.load %arg2[%250, %c7_52] : memref<4x12xf32, #tpu.memory_space<smem>>
    %252 = arith.index_cast %205 : i32 to index
    %c10_53 = arith.constant 10 : index
    %253 = memref.load %arg2[%252, %c10_53] : memref<4x12xf32, #tpu.memory_space<smem>>
    %254 = arith.index_cast %205 : i32 to index
    %c11_54 = arith.constant 11 : index
    %255 = memref.load %arg2[%254, %c11_54] : memref<4x12xf32, #tpu.memory_space<smem>>
    %256 = vector.broadcast %245 : f32 to vector<16x128xf32>
    %257 = arith.mulf %256, %21 : vector<16x128xf32>
    %258 = arith.addf %9, %257 : vector<16x128xf32>
    %259 = vector.broadcast %247 : f32 to vector<16x128xf32>
    %260 = arith.mulf %259, %24 : vector<16x128xf32>
    %261 = arith.subf %258, %260 : vector<16x128xf32>
    %262 = vector.broadcast %245 : f32 to vector<16x128xf32>
    %263 = arith.mulf %262, %24 : vector<16x128xf32>
    %264 = arith.addf %12, %263 : vector<16x128xf32>
    %265 = vector.broadcast %247 : f32 to vector<16x128xf32>
    %266 = arith.mulf %265, %21 : vector<16x128xf32>
    %267 = arith.addf %264, %266 : vector<16x128xf32>
    %268 = vector.broadcast %253 : f32 to vector<16x128xf32>
    %269 = arith.mulf %261, %268 : vector<16x128xf32>
    %270 = vector.broadcast %255 : f32 to vector<16x128xf32>
    %271 = arith.mulf %267, %270 : vector<16x128xf32>
    %272 = arith.subf %269, %271 : vector<16x128xf32>
    %273 = vector.broadcast %249 : f32 to vector<16x128xf32>
    %274 = arith.addf %273, %272 : vector<16x128xf32>
    %275 = vector.broadcast %255 : f32 to vector<16x128xf32>
    %276 = arith.mulf %261, %275 : vector<16x128xf32>
    %277 = vector.broadcast %253 : f32 to vector<16x128xf32>
    %278 = arith.mulf %267, %277 : vector<16x128xf32>
    %279 = arith.addf %276, %278 : vector<16x128xf32>
    %280 = vector.broadcast %251 : f32 to vector<16x128xf32>
    %281 = arith.addf %280, %279 : vector<16x128xf32>
    %282 = arith.mulf %274, %274 : vector<16x128xf32>
    %283 = arith.mulf %281, %281 : vector<16x128xf32>
    %284 = arith.addf %282, %283 : vector<16x128xf32>
    %cst_55 = arith.constant 9.99999996E-13 : f32
    %285 = vector.broadcast %cst_55 : f32 to vector<16x128xf32>
    %286 = arith.addf %284, %285 : vector<16x128xf32>
    %287 = math.rsqrt %286 : vector<16x128xf32>
    %288 = arith.mulf %236, %274 : vector<16x128xf32>
    %289 = arith.mulf %243, %281 : vector<16x128xf32>
    %290 = arith.addf %288, %289 : vector<16x128xf32>
    %291 = arith.mulf %290, %287 : vector<16x128xf32>
    %c2_56 = arith.constant 2 : index
    %c0_57 = arith.constant 0 : index
    %c0_58 = arith.constant 0 : index
    %292 = vector.load %arg4[%c2_56, %c0_57, %c0_58] : memref<4x16x128xf32, #tpu.memory_space<vmem>>, vector<1x16x128xf32>
    %293 = vector.shape_cast %292 : vector<1x16x128xf32> to vector<16x128xf32>
    %294 = vector.shape_cast %291 : vector<16x128xf32> to vector<1x16x128xf32>
    tpu.vector_store %arg4[%c2_56, %c0_57, %c0_58], %294 {strides = array<i32>} : memref<4x16x128xf32, #tpu.memory_space<vmem>>, vector<1x16x128xf32>,
    %c3_i32 = arith.constant 3 : i32
    %295 = arith.addi %0, %c3_i32 : i32
    %296 = arith.index_cast %295 : i32 to index
    %c0_59 = arith.constant 0 : index
    %297 = memref.load %arg2[%296, %c0_59] : memref<4x12xf32, #tpu.memory_space<smem>>
    %298 = arith.index_cast %295 : i32 to index
    %c1_60 = arith.constant 1 : index
    %299 = memref.load %arg2[%298, %c1_60] : memref<4x12xf32, #tpu.memory_space<smem>>
    %300 = arith.index_cast %295 : i32 to index
    %c4_61 = arith.constant 4 : index
    %301 = memref.load %arg2[%300, %c4_61] : memref<4x12xf32, #tpu.memory_space<smem>>
    %302 = arith.index_cast %295 : i32 to index
    %c5_62 = arith.constant 5 : index
    %303 = memref.load %arg2[%302, %c5_62] : memref<4x12xf32, #tpu.memory_space<smem>>
    %304 = arith.index_cast %295 : i32 to index
    %c8_63 = arith.constant 8 : index
    %305 = memref.load %arg2[%304, %c8_63] : memref<4x12xf32, #tpu.memory_space<smem>>
    %306 = arith.index_cast %295 : i32 to index
    %c9_64 = arith.constant 9 : index
    %307 = memref.load %arg2[%306, %c9_64] : memref<4x12xf32, #tpu.memory_space<smem>>
    %308 = vector.broadcast %297 : f32 to vector<16x128xf32>
    %309 = arith.mulf %308, %15 : vector<16x128xf32>
    %310 = arith.addf %3, %309 : vector<16x128xf32>
    %311 = vector.broadcast %299 : f32 to vector<16x128xf32>
    %312 = arith.mulf %311, %18 : vector<16x128xf32>
    %313 = arith.subf %310, %312 : vector<16x128xf32>
    %314 = vector.broadcast %297 : f32 to vector<16x128xf32>
    %315 = arith.mulf %314, %18 : vector<16x128xf32>
    %316 = arith.addf %6, %315 : vector<16x128xf32>
    %317 = vector.broadcast %299 : f32 to vector<16x128xf32>
    %318 = arith.mulf %317, %15 : vector<16x128xf32>
    %319 = arith.addf %316, %318 : vector<16x128xf32>
    %320 = vector.broadcast %305 : f32 to vector<16x128xf32>
    %321 = arith.mulf %313, %320 : vector<16x128xf32>
    %322 = vector.broadcast %307 : f32 to vector<16x128xf32>
    %323 = arith.mulf %319, %322 : vector<16x128xf32>
    %324 = arith.subf %321, %323 : vector<16x128xf32>
    %325 = vector.broadcast %301 : f32 to vector<16x128xf32>
    %326 = arith.addf %325, %324 : vector<16x128xf32>
    %327 = vector.broadcast %307 : f32 to vector<16x128xf32>
    %328 = arith.mulf %313, %327 : vector<16x128xf32>
    %329 = vector.broadcast %305 : f32 to vector<16x128xf32>
    %330 = arith.mulf %319, %329 : vector<16x128xf32>
    %331 = arith.addf %328, %330 : vector<16x128xf32>
    %332 = vector.broadcast %303 : f32 to vector<16x128xf32>
    %333 = arith.addf %332, %331 : vector<16x128xf32>
    %334 = arith.index_cast %295 : i32 to index
    %c2_65 = arith.constant 2 : index
    %335 = memref.load %arg2[%334, %c2_65] : memref<4x12xf32, #tpu.memory_space<smem>>
    %336 = arith.index_cast %295 : i32 to index
    %c3_66 = arith.constant 3 : index
    %337 = memref.load %arg2[%336, %c3_66] : memref<4x12xf32, #tpu.memory_space<smem>>
    %338 = arith.index_cast %295 : i32 to index
    %c6_67 = arith.constant 6 : index
    %339 = memref.load %arg2[%338, %c6_67] : memref<4x12xf32, #tpu.memory_space<smem>>
    %340 = arith.index_cast %295 : i32 to index
    %c7_68 = arith.constant 7 : index
    %341 = memref.load %arg2[%340, %c7_68] : memref<4x12xf32, #tpu.memory_space<smem>>
    %342 = arith.index_cast %295 : i32 to index
    %c10_69 = arith.constant 10 : index
    %343 = memref.load %arg2[%342, %c10_69] : memref<4x12xf32, #tpu.memory_space<smem>>
    %344 = arith.index_cast %295 : i32 to index
    %c11_70 = arith.constant 11 : index
    %345 = memref.load %arg2[%344, %c11_70] : memref<4x12xf32, #tpu.memory_space<smem>>
    %346 = vector.broadcast %335 : f32 to vector<16x128xf32>
    %347 = arith.mulf %346, %21 : vector<16x128xf32>
    %348 = arith.addf %9, %347 : vector<16x128xf32>
    %349 = vector.broadcast %337 : f32 to vector<16x128xf32>
    %350 = arith.mulf %349, %24 : vector<16x128xf32>
    %351 = arith.subf %348, %350 : vector<16x128xf32>
    %352 = vector.broadcast %335 : f32 to vector<16x128xf32>
    %353 = arith.mulf %352, %24 : vector<16x128xf32>
    %354 = arith.addf %12, %353 : vector<16x128xf32>
    %355 = vector.broadcast %337 : f32 to vector<16x128xf32>
    %356 = arith.mulf %355, %21 : vector<16x128xf32>
    %357 = arith.addf %354, %356 : vector<16x128xf32>
    %358 = vector.broadcast %343 : f32 to vector<16x128xf32>
    %359 = arith.mulf %351, %358 : vector<16x128xf32>
    %360 = vector.broadcast %345 : f32 to vector<16x128xf32>
    %361 = arith.mulf %357, %360 : vector<16x128xf32>
    %362 = arith.subf %359, %361 : vector<16x128xf32>
    %363 = vector.broadcast %339 : f32 to vector<16x128xf32>
    %364 = arith.addf %363, %362 : vector<16x128xf32>
    %365 = vector.broadcast %345 : f32 to vector<16x128xf32>
    %366 = arith.mulf %351, %365 : vector<16x128xf32>
    %367 = vector.broadcast %343 : f32 to vector<16x128xf32>
    %368 = arith.mulf %357, %367 : vector<16x128xf32>
    %369 = arith.addf %366, %368 : vector<16x128xf32>
    %370 = vector.broadcast %341 : f32 to vector<16x128xf32>
    %371 = arith.addf %370, %369 : vector<16x128xf32>
    %372 = arith.mulf %364, %364 : vector<16x128xf32>
    %373 = arith.mulf %371, %371 : vector<16x128xf32>
    %374 = arith.addf %372, %373 : vector<16x128xf32>
    %cst_71 = arith.constant 9.99999996E-13 : f32
    %375 = vector.broadcast %cst_71 : f32 to vector<16x128xf32>
    %376 = arith.addf %374, %375 : vector<16x128xf32>
    %377 = math.rsqrt %376 : vector<16x128xf32>
    %378 = arith.mulf %326, %364 : vector<16x128xf32>
    %379 = arith.mulf %333, %371 : vector<16x128xf32>
    %380 = arith.addf %378, %379 : vector<16x128xf32>
    %381 = arith.mulf %380, %377 : vector<16x128xf32>
    %c3_72 = arith.constant 3 : index
    %c0_73 = arith.constant 0 : index
    %c0_74 = arith.constant 0 : index
    %382 = vector.load %arg4[%c3_72, %c0_73, %c0_74] : memref<4x16x128xf32, #tpu.memory_space<vmem>>, vector<1x16x128xf32>
    %383 = vector.shape_cast %382 : vector<1x16x128xf32> to vector<16x128xf32>
    %384 = vector.shape_cast %381 : vector<16x128xf32> to vector<1x16x128xf32>
    tpu.vector_store %arg4[%c3_72, %c0_73, %c0_74], %384 {strides = array<i32>} : memref<4x16x128xf32, #tpu.memory_space<vmem>>, vector<1x16x128xf32>,
    return
  }
  func.func @transform_0(%arg0: i32, %arg1: i32) -> (i32, i32) {
    %c0_i32 = arith.constant 0 : i32
    %c0_i32_0 = arith.constant 0 : i32
    %c0_i32_1 = arith.constant 0 : i32
    return %c0_i32, %c0_i32_0 : i32, i32
  }
  func.func @transform_1(%arg0: i32, %arg1: i32) -> (i32, i32, i32) {
    %c0_i32 = arith.constant 0 : i32
    %c0_i32_0 = arith.constant 0 : i32
    %c0_i32_1 = arith.constant 0 : i32
    return %c0_i32, %arg0, %c0_i32_0 : i32, i32, i32
  }
  func.func @transform_2(%arg0: i32, %arg1: i32) -> (i32, i32, i32) {
    %c0_i32 = arith.constant 0 : i32
    %c0_i32_0 = arith.constant 0 : i32
    return %arg1, %arg0, %c0_i32 : i32, i32, i32
  }
}

</mosaic_0001>

<bundles_post_ra>
// kernel: tpu_custom_call.1
= control target key start
LH: loop header
LB: loop body
LE: loop exit
PB: predicated region body
PF: predicated region fallthrough
CT: control target
= control target key end

     0   :  { %7 = vsyncpa [#allocation5], 0  ;;  %s1164_s0 = inlined_call_operand.hbm [shape: f32[4,12], index: 0, kind: input, shape index: {}]   ;;  %s1165_s1 = inlined_call_operand.hbm [shape: bf16[8,16,128], index: 1, kind: input, shape index: {}]   ;;  %s1166_s2 = inlined_call_operand.hbm [shape: f32[4,16,128], index: 2, kind: output, shape index: {}]  }
   0x1   :  { %8 = vsyncpa [#allocation3], 0 }
   0x2   :  { %9 = vsyncpa [#allocation4], 0  ;;  %s683_s11 = scalar_lea.hbm %s1164_s0, 64 }
   0x3   :  { %p684_p0 = scmp.ne.s32.totalorder %s1164_s0, %s683_s11  ;;  %p687_p1 = scmp.lt.u32.totalorder %s683_s11, %s1164_s0 }
   0x5   :  { %p689_p2 = pnand %p687_p1, %p684_p0 }
   0x7   :  { %692 = shalt.err (!%p689_p2)
}
   0x8   :  { %s743_s16 = smov [#allocation2]   ;;  %s744_s19 = smov [#allocation6]  }
   0x9   :  { %17 = dma.hbm_to_smem %s1164_s0, 64, %s743_s16, [#allocation5]  }
   0xa   :  { %s23_s20 = sshll.u32 %s744_s19, 4  ;;  %s693_s23 = scalar_lea.hbm %s1165_s1, 1024  ;;  %s24_s20 = int_to_ptr.vmem [resolvable:$true] %s23_s20 }
   0xb   :  { %p694_p3 = scmp.ne.s32.totalorder %s1165_s1, %s693_s23  ;;  %p697_p4 = scmp.lt.u32.totalorder %s693_s23, %s1165_s1 }
   0xd   :  { %p699_p5 = pnand %p697_p4, %p694_p3 }
   0xf   :  { %702 = shalt.err (!%p699_p5)
}
  0x10   :  { %s703_s28 = scalar_lea.vmem %s24_s20, 1024  ;;  %p708_p7 = scmp.lt.s32.totalorder %s24_s20, %s24_s20 }
  0x11   :  { %p704_p6 = scmp.ne.s32.totalorder %s24_s20, %s703_s28  ;;  %p709_p8 = scmp.lt.s32.totalorder %s703_s28, %s703_s28 }
  0x13   :  { %p710_p9 = por %p709_p8, %p708_p7 }
  0x15   :  { %p711_p10 = pnand %p710_p9, %p704_p6 }
  0x17   :  { %714 = shalt.err (!%p711_p10)
}
  0x18   :  { %s745_s0 = smov 64   ;;  %s746_s29 = smov 4  }
  0x19   :  { %29 = dma.hbm_to_vmem [thread:$0]  %s1165_s1, 1024, %s24_s20, [#allocation3], %s745_s0, %s745_s0, %s746_s29  }
  0x1a   :  { %737 = dma.done.wait [#allocation5], 64  }
  0x1b   :  { %738 = vsyncadd [#allocation5], 4294967232 }
  0x1c   :  { %739 = dma.done.wait [#allocation3], 1024  }
  0x1d   :  { %740 = vsyncadd [#allocation3], 4294966272 }
  0x1e   :  { %36 = sfence }
  0x1f   :  { %v629_v0 = vld [vmem:[#allocation6] sm:$0xff]   ;;  %v633_v1 = vld [vmem:[#allocation6 + $0x8] sm:$0xff]   ;;  %v637_v2 = vld [vmem:[#allocation6 + $0x10] sm:$0xff]   ;;  %s78_s4 = sld [smem:[#allocation2]]  ;;  %s789_s5 = sld [smem:[#allocation2 + $0x1]] }
  0x20   :  { %v641_v3 = vld [vmem:[#allocation6 + $0x18] sm:$0xff]   ;;  %v645_v4 = vld [vmem:[#allocation6 + $0x20] sm:$0xff]   ;;  %v649_v5 = vld [vmem:[#allocation6 + $0x28] sm:$0xff]   ;;  %v791_v6 = vunpack.c.l.bf16 %v629_v0  ;;  %s793_s6 = sld [smem:[#allocation2 + $0x4]]  ;;  %s795_s1 = sld [smem:[#allocation2 + $0x5]]  ;;  %v797_v9 = vunpack.c.l.bf16 %v633_v1  ;;  %v799_v10 = vunpack.c.l.bf16 %v637_v2  ;;  %v807_v14 = vunpack.c.h.bf16 %v629_v0 }
  0x21   :  { %v653_v7 = vld [vmem:[#allocation6 + $0x30] sm:$0xff]   ;;  %v657_v8 = vld [vmem:[#allocation6 + $0x38] sm:$0xff]   ;;  %v801_v11 = vunpack.c.l.bf16 %v645_v4  ;;  %v803_v12 = vunpack.c.l.bf16 %v649_v5  ;;  %s584_s7 = sld [smem:[#allocation2 + $0x8]]  ;;  %s585_s8 = sld [smem:[#allocation2 + $0x9]]  ;;  %v805_v13 = vunpack.c.l.bf16 %v641_v3  ;;  %v809_v15 = vunpack.c.h.bf16 %v633_v1 }
  0x22   :  { %s586_s9 = sld [smem:[#allocation2 + $0x2]]  ;;  %s587_s10 = sld [smem:[#allocation2 + $0x3]]  ;;  %v811_v16 = vunpack.c.h.bf16 %v645_v4  ;;  %v813_v17 = vunpack.c.l.bf16 %v653_v7  ;;  %v815_v18 = vunpack.c.l.bf16 %v657_v8  ;;  %v821_v19 = vunpack.c.h.bf16 %v637_v2 }
  0x23   :  { %s817_s11 = sld [smem:[#allocation2 + $0x6]]  ;;  %s819_s12 = sld [smem:[#allocation2 + $0x7]]  ;;  %v823_v20 = vunpack.c.h.bf16 %v641_v3  ;;  %v825_v22 = vunpack.c.h.bf16 %v649_v5  ;;  %v827_v23 = vunpack.c.h.bf16 %v653_v7  ;;  %v829_v24 = vunpack.c.h.bf16 %v657_v8 }
  0x24   :  { %s590_s13 = sld [smem:[#allocation2 + $0xa]]  ;;  %s591_s14 = sld [smem:[#allocation2 + $0xb]] }
  0x25   :  { %v89_v21 = vstv %s78_s4  ;;  %v94_v26 = vstv %s789_s5  ;;  %s851_s15 = sld [smem:[#allocation2 + $0x80]]  ;;  %s869_s16 = sld [smem:[#allocation2 + $0x81]] }
  0x26   :  { %v90_v25 = vmul.f32 %v801_v11, %v89_v21  ;;  %v99_v27 = vmul.f32 %v803_v12, %v89_v21  ;;  %v91_v28 = vmul.f32 %v811_v16, %v89_v21  ;;  %v95_v29 = vmul.f32 %v803_v12, %v94_v26  ;;  %s875_s17 = sld [smem:[#allocation2 + $0x88]]  ;;  %s877_s18 = sld [smem:[#allocation2 + $0x89]] }
  0x27   :  { %v103_v30 = vmul.f32 %v801_v11, %v94_v26  ;;  %v115_v31 = vstv %s793_s6  ;;  %v124_v32 = vstv %s795_s1  ;;  %v107_v35 = vstv %s584_s7  ;;  %s889_s19 = sld [smem:[#allocation2 + $0x82]]  ;;  %s893_s20 = sld [smem:[#allocation2 + $0x83]] }
  0x28   :  { %v92_v33 = vadd.f32 %v791_v6, %v90_v25  ;;  %v101_v34 = vadd.f32 %v797_v9, %v99_v27  ;;  %v110_v36 = vstv %s585_s8  ;;  %v139_v37 = vstv %s586_s9  ;;  %s898_s21 = sld [smem:[#allocation2 + $0x84]]  ;;  %s900_s22 = sld [smem:[#allocation2 + $0x85]] }
  0x29   :  { %v144_v38 = vstv %s587_s10  ;;  %v93_v39 = vadd.f32 %v807_v14, %v91_v28  ;;  %v96_v40 = vmul.f32 %v825_v22, %v94_v26  ;;  %v140_v43 = vmul.f32 %v813_v17, %v139_v37  ;;  %s916_s23 = sld [smem:[#allocation2 + $0x8a]]  ;;  %s920_s24 = sld [smem:[#allocation2 + $0x86]] }
  0x2a   :  { %v97_v41 = vsub.f32 %v92_v33, %v95_v29  ;;  %v105_v42 = vadd.f32 %v103_v30, %v101_v34  ;;  %v145_v44 = vmul.f32 %v815_v18, %v144_v38  ;;  %v149_v45 = vmul.f32 %v815_v18, %v139_v37  ;;  %s922_s25 = sld [smem:[#allocation2 + $0x8b]]  ;;  %s924_s26 = sld [smem:[#allocation2 + $0x87]] }
  0x2b   :  { %v153_v46 = vmul.f32 %v813_v17, %v144_v38  ;;  %v847_v47 = vstv %s590_s13  ;;  %v849_v48 = vstv %s591_s14  ;;  %v142_v53 = vadd.f32 %v799_v10, %v140_v43  ;;  %s946_s27 = sld [smem:[#allocation2 + $0x100]]  ;;  %s965_s28 = sld [smem:[#allocation2 + $0x101]] }
  0x2c   :  { %v108_v49 = vmul.f32 %v107_v35, %v97_v41  ;;  %v111_v50 = vmul.f32 %v110_v36, %v105_v42  ;;  %v118_v51 = vmul.f32 %v110_v36, %v97_v41  ;;  %v120_v52 = vmul.f32 %v107_v35, %v105_v42  ;;  %s984_s0 = sld [smem:[#allocation2 + $0x108]]  ;;  %s990_s29 = sld [smem:[#allocation2 + $0x109]] }
  0x2d   :  { %v151_v54 = vadd.f32 %v805_v13, %v149_v45  ;;  %v165_v55 = vstv %s817_s11  ;;  %v174_v56 = vstv %s819_s12  ;;  %v98_v59 = vsub.f32 %v93_v39, %v96_v40  ;;  %s992_s30 = sld [smem:[#allocation2 + $0x102]]  ;;  %s994_s3 = sld [smem:[#allocation2 + $0x103]] }
  0x2e   :  { %v113_v57 = vsub.f32 %v108_v49, %v111_v50  ;;  %v122_v58 = vadd.f32 %v120_v52, %v118_v51  ;;  %v100_v60 = vmul.f32 %v825_v22, %v89_v21  ;;  %v147_v61 = vsub.f32 %v142_v53, %v145_v44  ;;  %s996_s4 = sld [smem:[#allocation2 + $0x104]]  ;;  %s1008_s5 = sld [smem:[#allocation2 + $0x10a]] }
  0x2f   :  { %v155_v62 = vadd.f32 %v153_v46, %v151_v54  ;;  %v104_v63 = vmul.f32 %v811_v16, %v94_v26  ;;  %v141_v0 = vmul.f32 %v827_v23, %v139_v37  ;;  %v109_v4 = vmul.f32 %v107_v35, %v98_v59  ;;  %s1016_s6 = sld [smem:[#allocation2 + $0x106]]  ;;  %s615_s1 = sld [smem:[#allocation2 + $0x10b]] }
  0x30   :  { %v116_v1 = vadd.f32 %v115_v31, %v113_v57  ;;  %v125_v2 = vadd.f32 %v124_v32, %v122_v58  ;;  %v102_v3 = vadd.f32 %v809_v15, %v100_v60  ;;  %v158_v5 = vmul.f32 %v847_v47, %v147_v61  ;;  %s1028_s7 = sld [smem:[#allocation2 + $0x107]]  ;;  %s1035_s8 = sld [smem:[#allocation2 + $0x180]] }
  0x31   :  { %v161_v7 = vmul.f32 %v849_v48, %v155_v62  ;;  %v168_v8 = vmul.f32 %v849_v48, %v147_v61  ;;  %v170_v21 = vmul.f32 %v847_v47, %v155_v62  ;;  %v119_v26 = vmul.f32 %v110_v36, %v98_v59  ;;  %s1046_s9 = sld [smem:[#allocation2 + $0x105]]  ;;  %s1052_s10 = sld [smem:[#allocation2 + $0x181]] }
  0x32   :  { %v106_v25 = vadd.f32 %v104_v63, %v102_v3  ;;  %v143_v27 = vadd.f32 %v821_v19, %v141_v0  ;;  %v146_v28 = vmul.f32 %v829_v24, %v144_v38  ;;  %v150_v33 = vmul.f32 %v829_v24, %v139_v37  ;;  %s1069_s11 = sld [smem:[#allocation2 + $0x188]]  ;;  %s1076_s12 = sld [smem:[#allocation2 + $0x182]] }
  0x33   :  { %v163_v29 = vsub.f32 %v158_v5, %v161_v7  ;;  %v172_v30 = vadd.f32 %v170_v21, %v168_v8  ;;  %v154_v34 = vmul.f32 %v827_v23, %v144_v38  ;;  %v880_v42 = vstv %s851_s15  ;;  %s1078_s13 = sld [smem:[#allocation2 + $0x189]]  ;;  %s1080_s14 = sld [smem:[#allocation2 + $0x183]] }
  0x34   :  { %v112_v39 = vmul.f32 %v110_v36, %v106_v25  ;;  %v121_v40 = vmul.f32 %v107_v35, %v106_v25  ;;  %v148_v41 = vsub.f32 %v143_v27, %v146_v28  ;;  %v152_v45 = vadd.f32 %v823_v20, %v150_v33  ;;  %s1089_s15 = sld [smem:[#allocation2 + $0x18a]] }
  0x35   :  { %v166_v43 = vadd.f32 %v165_v55, %v163_v29  ;;  %v175_v44 = vadd.f32 %v174_v56, %v172_v30  ;;  %v211_v37 = vmul.f32 %v801_v11, %v880_v42  ;;  %v215_v59 = vstv %s869_s16  ;;  %s1091_s16 = sld [smem:[#allocation2 + $0x18b]] }
  0x36   :  { %v114_v38 = vsub.f32 %v109_v4, %v112_v39  ;;  %v123_v46 = vadd.f32 %v121_v40, %v119_v26  ;;  %v159_v49 = vmul.f32 %v847_v47, %v148_v41  ;;  %v169_v50 = vmul.f32 %v849_v48, %v148_v41 }
  0x37   :  { %v177_v36 = vmul.f32 %v166_v43, %v166_v43  ;;  %v179_v35 = vmul.f32 %v175_v44, %v175_v44  ;;  %v187_v51 = vmul.f32 %v166_v43, %v116_v1  ;;  %v189_v52 = vmul.f32 %v175_v44, %v125_v2 }
  0x38   :  { %v156_v53 = vadd.f32 %v154_v34, %v152_v45  ;;  %v213_v54 = vadd.f32 %v791_v6, %v211_v37  ;;  %v117_v58 = vadd.f32 %v115_v31, %v114_v38  ;;  %v220_v60 = vmul.f32 %v803_v12, %v880_v42 }
  0x39   :  { %v181_v57 = vadd.f32 %v179_v35, %v177_v36  ;;  %v216_v63 = vmul.f32 %v803_v12, %v215_v59  ;;  %v224_v0 = vmul.f32 %v801_v11, %v215_v59  ;;  %v911_v2 = vstv %s875_s17  ;;  %s1103_s17 = sld [smem:[#allocation2 + $0x186]] }
  0x3a   :  { %v162_v61 = vmul.f32 %v849_v48, %v156_v53  ;;  %v171_v62 = vmul.f32 %v847_v47, %v156_v53  ;;  %v222_v31 = vadd.f32 %v797_v9, %v220_v60  ;;  %v914_v3 = vstv %s877_s18  ;;  %s1109_s18 = sld [smem:[#allocation2 + $0x187]] }
  0x3b   :  { %v183_v1 = vadd.f32 1e-12, %v181_v57  ;;  %v126_v48 = vadd.f32 %v124_v32, %v123_v46  ;;  %v218_v5 = vsub.f32 %v213_v54, %v216_v63  ;;  %v191_v7 = vadd.f32 %v189_v52, %v187_v51 }
  0x3c   :  { %v164_v4 = vsub.f32 %v159_v49, %v162_v61  ;;  %v173_v47 = vadd.f32 %v171_v62, %v169_v50  ;;  %v226_v8 = vadd.f32 %v224_v0, %v222_v31  ;;  %v260_v21 = vstv %s889_s19  ;;  %s1120_s19 = sld [smem:[#allocation2 + $0x184]] }
  0x3d   :  { %667 = vrsqrt.f32 %v183_v1  ;;  %v932_v26 = vmul.f32 %v911_v2, %v218_v5  ;;  %v239_v27 = vmul.f32 %v914_v3, %v218_v5  ;;  %v261_v30 = vmul.f32 %v813_v17, %v260_v21 }
  0x3e   :  { %v167_v25 = vadd.f32 %v165_v55, %v164_v4  ;;  %v176_v32 = vadd.f32 %v174_v56, %v173_v47  ;;  %v232_v28 = vmul.f32 %v914_v3, %v226_v8  ;;  %v241_v29 = vmul.f32 %v911_v2, %v226_v8 }
  0x3f   :  { %v265_v33 = vstv %s893_s20  ;;  %v236_v55 = vstv %s898_s21  ;;  %v245_v56 = vstv %s900_s22  ;;  %v263_v43 = vadd.f32 %v799_v10, %v261_v30  ;;  %s1122_s20 = sld [smem:[#allocation2 + $0x185]]  ;;  %s747_s21 = smov [#allocation7]  }
  0x40   :  { %v178_v34 = vmul.f32 %v167_v25, %v167_v25  ;;  %v180_v39 = vmul.f32 %v176_v32, %v176_v32  ;;  %v188_v40 = vmul.f32 %v167_v25, %v117_v58  ;;  %v190_v41 = vmul.f32 %v176_v32, %v126_v48  ;;  %s568_s22 = sshll.u32 %s747_s21, 4  ;;  %s569_s22 = int_to_ptr.vmem [resolvable:$true] %s568_s22 }
  0x41   :  { %v266_v44 = vmul.f32 %v815_v18, %v265_v33  ;;  %v234_v37 = vsub.f32 %v932_v26, %v232_v28  ;;  %v270_v38 = vmul.f32 %v815_v18, %v260_v21  ;;  %v274_v46 = vmul.f32 %v813_v17, %v265_v33  ;;  %p720_p12 = scmp.lt.s32.totalorder %s569_s22, %s569_s22 }
  0x42   :  { %v182_v45 = vadd.f32 %v180_v39, %v178_v34  ;;  %v948_v36 = vadd.f32 %v190_v41, %v188_v40  ;;  %v243_v35 = vadd.f32 %v241_v29, %v239_v27  ;;  %v278_v50 = vstv %s916_s23  ;;  %s715_s23 = scalar_lea.vmem %s569_s22, 1024 }
  0x43   :  { %v268_v49 = vsub.f32 %v263_v43, %v266_v44  ;;  %v272_v52 = vadd.f32 %v805_v13, %v270_v38  ;;  %v281_v53 = vstv %s922_s25  ;;  %v286_v54 = vstv %s920_s24  ;;  %p716_p11 = scmp.ne.s32.totalorder %s569_s22, %s715_s23  ;;  %p721_p13 = scmp.lt.s32.totalorder %s715_s23, %s715_s23 }
  0x44   :  { %v184_v51 = vadd.f32 1e-12, %v182_v45  ;;  %v295_v60 = vstv %s924_s26  ;;  %v212_v61 = vmul.f32 %v811_v16, %v880_v42  ;;  %v217_v63 = vmul.f32 %v825_v22, %v215_v59 }
  0x45   :  { %v279_v57 = vmul.f32 %v278_v50, %v268_v49  ;;  %v289_v58 = vmul.f32 %v281_v53, %v268_v49  ;;  %v276_v62 = vadd.f32 %v274_v46, %v272_v52  ;;  %v221_v0 = vmul.f32 %v825_v22, %v880_v42  ;;  %p722_p0 = por %p721_p13, %p720_p12 }
  0x46   :  { %669 = vrsqrt.f32 %v184_v51  ;;  %v214_v31 = vadd.f32 %v807_v14, %v212_v61  ;;  %v225_v48 = vmul.f32 %v811_v16, %v215_v59  ;;  %v262_v4 = vmul.f32 %v827_v23, %v260_v21 }
  0x47   :  { %v668_v1 = vpop.eup %667  ;;  %v267_v47 = vmul.f32 %v829_v24, %v265_v33  ;;  %v282_v8 = vmul.f32 %v281_v53, %v276_v62  ;;  %v291_v25 = vmul.f32 %v278_v50, %v276_v62  ;;  %v223_v32 = vadd.f32 %v809_v15, %v221_v0  ;;  %p723_p1 = pnand %p722_p0, %p716_p11 }
  0x48   :  { %v193_v5 = vmul.f32 %v668_v1, %v191_v7  ;;  %v219_v42 = vsub.f32 %v214_v31, %v217_v63  ;;  %v264_v26 = vadd.f32 %v821_v19, %v262_v4  ;;  %v271_v59 = vmul.f32 %v829_v24, %v260_v21 }
  0x49   :  { %v275_v27 = vmul.f32 %v827_v23, %v265_v33  ;;  %v284_v28 = vsub.f32 %v279_v57, %v282_v8  ;;  %v293_v29 = vadd.f32 %v291_v25, %v289_v58  ;;  %v227_v7 = vadd.f32 %v225_v48, %v223_v32 }
  0x4a   :  { %195 = vst [vmem:[#allocation7] sm:$0xff] %v193_v5  ;;  %v971_v30 = vstv %s946_s27  ;;  %v230_v34 = vmul.f32 %v911_v2, %v219_v42  ;;  %v240_v39 = vmul.f32 %v914_v3, %v219_v42  ;;  %v269_v40 = vsub.f32 %v264_v26, %v267_v47 }
  0x4b   :  { %v273_v41 = vadd.f32 %v823_v20, %v271_v59  ;;  %v287_v43 = vadd.f32 %v286_v54, %v284_v28  ;;  %v296_v21 = vadd.f32 %v295_v60, %v293_v29  ;;  %v233_v33 = vmul.f32 %v914_v3, %v227_v7 }
  0x4c   :  { %v242_v44 = vmul.f32 %v911_v2, %v227_v7  ;;  %v237_v45 = vadd.f32 %v236_v55, %v234_v37  ;;  %v280_v46 = vmul.f32 %v278_v50, %v269_v40  ;;  %v333_v49 = vmul.f32 %v801_v11, %v971_v30 }
  0x4d   :  { %v277_v38 = vadd.f32 %v275_v27, %v273_v41  ;;  %v246_v51 = vadd.f32 %v245_v56, %v243_v35  ;;  %v298_v52 = vmul.f32 %v287_v43, %v287_v43  ;;  %v300_v57 = vmul.f32 %v296_v21, %v296_v21 }
  0x4e   :  { %v290_v58 = vmul.f32 %v281_v53, %v269_v40  ;;  %v235_v2 = vsub.f32 %v230_v34, %v233_v33  ;;  %v244_v3 = vadd.f32 %v242_v44, %v240_v39  ;;  %v335_v35 = vadd.f32 %v791_v6, %v333_v49 }
  0x4f   :  { %v283_v37 = vmul.f32 %v281_v53, %v277_v38  ;;  %v292_v61 = vmul.f32 %v278_v50, %v277_v38  ;;  %v302_v63 = vadd.f32 %v300_v57, %v298_v52  ;;  %v337_v0 = vstv %s965_s28 }
  0x50   :  { %v670_v62 = vpop.eup %669  ;;  %v238_v31 = vadd.f32 %v236_v55, %v235_v2  ;;  %v247_v53 = vadd.f32 %v245_v56, %v244_v3  ;;  %v338_v47 = vmul.f32 %v803_v12, %v337_v0  ;;  %v342_v5 = vmul.f32 %v803_v12, %v971_v30 }
  0x51   :  { %v194_v1 = vmul.f32 %v670_v62, %v948_v36  ;;  %v285_v50 = vsub.f32 %v280_v46, %v283_v37  ;;  %v304_v48 = vadd.f32 1e-12, %v302_v63  ;;  %v294_v4 = vadd.f32 %v292_v61, %v290_v58 }
  0x52   :  { %v308_v8 = vmul.f32 %v287_v43, %v237_v45  ;;  %v310_v25 = vmul.f32 %v296_v21, %v246_v51  ;;  %v346_v56 = vmul.f32 %v801_v11, %v337_v0  ;;  %v340_v32 = vsub.f32 %v335_v35, %v338_v47 }
  0x53   :  { %196 = vst [vmem:[#allocation7 + $0x8] sm:$0xff] %v194_v1  ;;  %v288_v55 = vadd.f32 %v286_v54, %v285_v50  ;;  %671 = vrsqrt.f32 %v304_v48  ;;  %v297_v36 = vadd.f32 %v295_v60, %v294_v4  ;;  %v344_v42 = vadd.f32 %v797_v9, %v342_v5 }
  0x54   :  { %v1019_v59 = vstv %s984_s0  ;;  %v353_v7 = vstv %s990_s29  ;;  %v382_v34 = vstv %s992_s30  ;;  %v387_v39 = vstv %s994_s3 }
  0x55   :  { %v299_v26 = vmul.f32 %v288_v55, %v288_v55  ;;  %v301_v27 = vmul.f32 %v297_v36, %v297_v36  ;;  %v309_v28 = vmul.f32 %v288_v55, %v238_v31  ;;  %v311_v29 = vmul.f32 %v297_v36, %v247_v53 }
  0x56   :  { %v348_v54 = vadd.f32 %v346_v56, %v344_v42  ;;  %v312_v40 = vadd.f32 %v310_v25, %v308_v8  ;;  %v1025_v41 = vmul.f32 %v1019_v59, %v340_v32  ;;  %v358_v43 = vstv %s996_s4 }
  0x57   :  { %v303_v60 = vadd.f32 %v301_v27, %v299_v26  ;;  %v383_v21 = vmul.f32 %v813_v17, %v382_v34  ;;  %v388_v33 = vmul.f32 %v815_v18, %v387_v39  ;;  %v392_v44 = vmul.f32 %v815_v18, %v382_v34 }
  0x58   :  { %v396_v45 = vmul.f32 %v813_v17, %v387_v39  ;;  %v313_v46 = vadd.f32 %v311_v29, %v309_v28  ;;  %v361_v49 = vmul.f32 %v353_v7, %v340_v32  ;;  %v400_v51 = vstv %s1008_s5 }
  0x59   :  { %v305_v38 = vadd.f32 1e-12, %v303_v60  ;;  %v354_v52 = vmul.f32 %v353_v7, %v348_v54  ;;  %v363_v57 = vmul.f32 %v1019_v59, %v348_v54  ;;  %v385_v58 = vadd.f32 %v799_v10, %v383_v21 }
  0x5a   :  { %v394_v2 = vadd.f32 %v805_v13, %v392_v44  ;;  %v403_v3 = vstv %s615_s1  ;;  %v408_v37 = vstv %s1016_s6  ;;  %v334_v61 = vmul.f32 %v811_v16, %v971_v30 }
  0x5b   :  { %673 = vrsqrt.f32 %v305_v38  ;;  %v390_v62 = vsub.f32 %v385_v58, %v388_v33  ;;  %v339_v35 = vmul.f32 %v825_v22, %v337_v0  ;;  %v343_v1 = vmul.f32 %v825_v22, %v971_v30 }
  0x5c   :  { %v398_v63 = vadd.f32 %v396_v45, %v394_v2  ;;  %v336_v53 = vadd.f32 %v807_v14, %v334_v61  ;;  %v347_v50 = vmul.f32 %v811_v16, %v337_v0  ;;  %v384_v48 = vmul.f32 %v827_v23, %v382_v34 }
  0x5d   :  { %v672_v31 = vpop.eup %671  ;;  %v389_v4 = vmul.f32 %v829_v24, %v387_v39  ;;  %v401_v5 = vmul.f32 %v400_v51, %v390_v62  ;;  %v411_v30 = vmul.f32 %v403_v3, %v390_v62  ;;  %v345_v56 = vadd.f32 %v809_v15, %v343_v1 }
  0x5e   :  { %v314_v47 = vmul.f32 %v672_v31, %v312_v40  ;;  %v404_v8 = vmul.f32 %v403_v3, %v398_v63  ;;  %v413_v25 = vmul.f32 %v400_v51, %v398_v63  ;;  %v341_v55 = vsub.f32 %v336_v53, %v339_v35 }
  0x5f   :  { %v386_v36 = vadd.f32 %v821_v19, %v384_v48  ;;  %v417_v32 = vstv %s1028_s7  ;;  %v393_v42 = vmul.f32 %v829_v24, %v382_v34  ;;  %v397_v26 = vmul.f32 %v827_v23, %v387_v39 }
  0x60   :  { %317 = vst [vmem:[#allocation7 + $0x10] sm:$0xff] %v314_v47  ;;  %v406_v0 = vsub.f32 %v401_v5, %v404_v8  ;;  %v356_v27 = vsub.f32 %v1025_v41, %v354_v52  ;;  %v415_v28 = vadd.f32 %v413_v25, %v411_v30  ;;  %v349_v29 = vadd.f32 %v347_v50, %v345_v56 }
  0x61   :  { %v1061_v54 = vstv %s1035_s8  ;;  %v352_v60 = vmul.f32 %v1019_v59, %v341_v55  ;;  %v391_v21 = vsub.f32 %v386_v36, %v389_v4  ;;  %v395_v33 = vadd.f32 %v823_v20, %v393_v42 }
  0x62   :  { %v409_v40 = vadd.f32 %v408_v37, %v406_v0  ;;  %v418_v44 = vadd.f32 %v417_v32, %v415_v28  ;;  %v355_v45 = vmul.f32 %v353_v7, %v349_v29  ;;  %v362_v34 = vmul.f32 %v353_v7, %v341_v55 }
  0x63   :  { %v364_v39 = vmul.f32 %v1019_v59, %v349_v29  ;;  %v365_v38 = vadd.f32 %v363_v57, %v361_v49  ;;  %v399_v52 = vadd.f32 %v397_v26, %v395_v33  ;;  %v402_v58 = vmul.f32 %v400_v51, %v391_v21 }
  0x64   :  { %v420_v41 = vmul.f32 %v409_v40, %v409_v40  ;;  %v367_v61 = vstv %s1046_s9  ;;  %v422_v62 = vmul.f32 %v418_v44, %v418_v44  ;;  %v455_v63 = vmul.f32 %v801_v11, %v1061_v54 }
  0x65   :  { %v674_v2 = vpop.eup %673  ;;  %v1074_v35 = vstv %s1052_s10  ;;  %v405_v1 = vmul.f32 %v403_v3, %v399_v52  ;;  %v412_v59 = vmul.f32 %v403_v3, %v391_v21  ;;  %v414_v49 = vmul.f32 %v400_v51, %v399_v52 }
  0x66   :  { %v315_v7 = vmul.f32 %v674_v2, %v313_v46  ;;  %v359_v57 = vadd.f32 %v358_v43, %v356_v27  ;;  %v424_v31 = vadd.f32 %v422_v62, %v420_v41  ;;  %v357_v53 = vsub.f32 %v352_v60, %v355_v45 }
  0x67   :  { %v366_v50 = vadd.f32 %v364_v39, %v362_v34  ;;  %v368_v48 = vadd.f32 %v367_v61, %v365_v38  ;;  %v407_v4 = vsub.f32 %v402_v58, %v405_v1  ;;  %v416_v47 = vadd.f32 %v414_v49, %v412_v59 }
  0x68   :  { %318 = vst [vmem:[#allocation7 + $0x18] sm:$0xff] %v315_v7  ;;  %v426_v5 = vadd.f32 1e-12, %v424_v31  ;;  %v457_v46 = vadd.f32 %v791_v6, %v455_v63  ;;  %v460_v51 = vmul.f32 %v803_v12, %v1074_v35  ;;  %v464_v3 = vmul.f32 %v803_v12, %v1061_v54 }
  0x69   :  { %v410_v8 = vadd.f32 %v408_v37, %v407_v4  ;;  %v419_v30 = vadd.f32 %v417_v32, %v416_v47  ;;  %v430_v25 = vmul.f32 %v409_v40, %v359_v57  ;;  %v360_v6 = vadd.f32 %v358_v43, %v357_v53 }
  0x6a   :  { %675 = vrsqrt.f32 %v426_v5  ;;  %v369_v55 = vadd.f32 %v367_v61, %v366_v50  ;;  %v466_v0 = vadd.f32 %v797_v9, %v464_v3  ;;  %v468_v12 = vmul.f32 %v801_v11, %v1074_v35 }
  0x6b   :  { %v421_v56 = vmul.f32 %v410_v8, %v410_v8  ;;  %v423_v36 = vmul.f32 %v419_v30, %v419_v30  ;;  %v432_v42 = vmul.f32 %v418_v44, %v368_v48  ;;  %v462_v26 = vsub.f32 %v457_v46, %v460_v51 }
  0x6c   :  { %v1101_v27 = vstv %s1069_s11  ;;  %v504_v37 = vstv %s1076_s12  ;;  %v1107_v28 = vstv %s1078_s13  ;;  %v509_v9 = vstv %s1080_s14 }
  0x6d   :  { %v425_v32 = vadd.f32 %v423_v36, %v421_v56  ;;  %v505_v43 = vmul.f32 %v813_v17, %v504_v37  ;;  %v431_v29 = vmul.f32 %v410_v8, %v360_v6  ;;  %v433_v40 = vmul.f32 %v419_v30, %v369_v55 }
  0x6e   :  { %v510_v11 = vmul.f32 %v815_v18, %v509_v9  ;;  %v514_v60 = vmul.f32 %v815_v18, %v504_v37  ;;  %v470_v33 = vadd.f32 %v468_v12, %v466_v0  ;;  %v518_v45 = vmul.f32 %v813_v17, %v509_v9 }
  0x6f   :  { %v427_v21 = vadd.f32 1e-12, %v425_v32  ;;  %v507_v44 = vadd.f32 %v799_v10, %v505_v43  ;;  %v522_v39 = vstv %s1089_s15  ;;  %v525_v38 = vstv %s1091_s16 }
  0x70   :  { %v516_v34 = vadd.f32 %v805_v13, %v514_v60  ;;  %v434_v41 = vadd.f32 %v432_v42, %v430_v25  ;;  %v435_v58 = vadd.f32 %v433_v40, %v431_v29  ;;  %v473_v18 = vmul.f32 %v1101_v27, %v462_v26 }
  0x71   :  { %677 = vrsqrt.f32 %v427_v21  ;;  %v512_v52 = vsub.f32 %v507_v44, %v510_v11  ;;  %v483_v10 = vmul.f32 %v1107_v28, %v462_v26  ;;  %v476_v17 = vmul.f32 %v1107_v28, %v470_v33 }
  0x72   :  { %v520_v2 = vadd.f32 %v518_v45, %v516_v34  ;;  %v456_v62 = vmul.f32 %v811_v16, %v1061_v54  ;;  %v530_v1 = vstv %s1103_s17  ;;  %v465_v49 = vmul.f32 %v825_v22, %v1061_v54 }
  0x73   :  { %v523_v13 = vmul.f32 %v522_v39, %v512_v52  ;;  %v533_v61 = vmul.f32 %v525_v38, %v512_v52  ;;  %v539_v31 = vstv %s1109_s18  ;;  %v506_v53 = vmul.f32 %v827_v23, %v504_v37 }
  0x74   :  { %v676_v63 = vpop.eup %675  ;;  %v526_v7 = vmul.f32 %v525_v38, %v520_v2  ;;  %v535_v59 = vmul.f32 %v522_v39, %v520_v2  ;;  %v511_v50 = vmul.f32 %v829_v24, %v509_v9  ;;  %v485_v48 = vmul.f32 %v1101_v27, %v470_v33 }
  0x75   :  { %v436_v57 = vmul.f32 %v676_v63, %v434_v41  ;;  %v515_v5 = vmul.f32 %v829_v24, %v504_v37  ;;  %v458_v46 = vadd.f32 %v807_v14, %v456_v62  ;;  %v461_v54 = vmul.f32 %v825_v22, %v1074_v35 }
  0x76   :  { %v528_v4 = vsub.f32 %v523_v13, %v526_v7  ;;  %v537_v47 = vadd.f32 %v535_v59, %v533_v61  ;;  %v508_v51 = vadd.f32 %v821_v19, %v506_v53  ;;  %v519_v3 = vmul.f32 %v827_v23, %v509_v9 }
  0x77   :  { %439 = vst [vmem:[#allocation7 + $0x20] sm:$0xff] %v436_v57  ;;  %v467_v25 = vadd.f32 %v809_v15, %v465_v49  ;;  %v469_v6 = vmul.f32 %v811_v16, %v1074_v35  ;;  %v480_v55 = vstv %s1120_s19  ;;  %v517_v24 = vadd.f32 %v823_v20, %v515_v5 }
  0x78   :  { %v531_v8 = vadd.f32 %v530_v1, %v528_v4  ;;  %v540_v30 = vadd.f32 %v539_v31, %v537_v47  ;;  %v513_v56 = vsub.f32 %v508_v51, %v511_v50  ;;  %v478_v36 = vsub.f32 %v473_v18, %v476_v17 }
  0x79   :  { %v489_v14 = vstv %s1122_s20  ;;  %v487_v42 = vadd.f32 %v485_v48, %v483_v10  ;;  %v463_v19 = vsub.f32 %v458_v46, %v461_v54  ;;  %v521_v26 = vadd.f32 %v519_v3, %v517_v24 }
  0x7a   :  { %v542_v0 = vmul.f32 %v531_v8, %v531_v8  ;;  %v544_v12 = vmul.f32 %v540_v30, %v540_v30  ;;  %v524_v23 = vmul.f32 %v522_v39, %v513_v56  ;;  %v471_v43 = vadd.f32 %v469_v6, %v467_v25 }
  0x7b   :  { %v678_v22 = vpop.eup %677  ;;  %v534_v15 = vmul.f32 %v525_v38, %v513_v56  ;;  %v527_v9 = vmul.f32 %v525_v38, %v521_v26  ;;  %v536_v29 = vmul.f32 %v522_v39, %v521_v26  ;;  %v481_v16 = vadd.f32 %v480_v55, %v478_v36 }
  0x7c   :  { %v437_v37 = vmul.f32 %v678_v22, %v435_v58  ;;  %v546_v32 = vadd.f32 %v544_v12, %v542_v0  ;;  %v490_v40 = vadd.f32 %v489_v14, %v487_v42  ;;  %v474_v20 = vmul.f32 %v1101_v27, %v463_v19 }
  0x7d   :  { %v529_v11 = vsub.f32 %v524_v23, %v527_v9  ;;  %v538_v60 = vadd.f32 %v536_v29, %v534_v15  ;;  %v477_v21 = vmul.f32 %v1107_v28, %v471_v43  ;;  %v484_v33 = vmul.f32 %v1107_v28, %v463_v19 }
  0x7e   :  { %440 = vst [vmem:[#allocation7 + $0x28] sm:$0xff] %v437_v37  ;;  %v548_v35 = vadd.f32 1e-12, %v546_v32  ;;  %v486_v44 = vmul.f32 %v1101_v27, %v471_v43  ;;  %v552_v41 = vmul.f32 %v531_v8, %v481_v16  ;;  %v554_v38 = vmul.f32 %v540_v30, %v490_v40 }
  0x7f   :  { %v532_v45 = vadd.f32 %v530_v1, %v529_v11  ;;  %v541_v34 = vadd.f32 %v539_v31, %v538_v60  ;;  %v479_v58 = vsub.f32 %v474_v20, %v477_v21 }
  0x80   :  { %679 = vrsqrt.f32 %v548_v35  ;;  %v488_v18 = vadd.f32 %v486_v44, %v484_v33  ;;  %v556_v2 = vadd.f32 %v554_v38, %v552_v41 }
  0x81   :  { %v543_v39 = vmul.f32 %v532_v45, %v532_v45  ;;  %v545_v52 = vmul.f32 %v541_v34, %v541_v34  ;;  %v482_v13 = vadd.f32 %v480_v55, %v479_v58 }
  0x82   :  { %v491_v61 = vadd.f32 %v489_v14, %v488_v18 }
  0x83   :  { %v547_v10 = vadd.f32 %v545_v52, %v543_v39  ;;  %v553_v7 = vmul.f32 %v532_v45, %v482_v13 }
  0x84   :  { %v555_v28 = vmul.f32 %v541_v34, %v491_v61 }
  0x85   :  { %v549_v17 = vadd.f32 1e-12, %v547_v10 }
  0x86   :  { %v557_v27 = vadd.f32 %v555_v28, %v553_v7 }
  0x87   :  { %681 = vrsqrt.f32 %v549_v17 }
  0x8a   :  { %v680_v62 = vpop.eup %679 }
  0x8b   :  { %v558_v63 = vmul.f32 %v680_v62, %v556_v2 }
  0x8d   :  { %561 = vst [vmem:[#allocation7 + $0x30] sm:$0xff] %v558_v63 }
  0x91   :  { %v682_v1 = vpop.eup %681 }
  0x92   :  { %v559_v59 = vmul.f32 %v682_v1, %v557_v27 }
  0x94   :  { %562 = vst [vmem:[#allocation7 + $0x38] sm:$0xff] %v559_v59 }
  0x95   :  { %726 = shalt.err (!%p723_p1)
}
  0x96   :  { %s727_s26 = scalar_lea.hbm %s1166_s2, 1024 }
  0x97   :  { %p728_p2 = scmp.ne.s32.totalorder %s1166_s2, %s727_s26  ;;  %p731_p3 = scmp.lt.u32.totalorder %s727_s26, %s1166_s2 }
  0x99   :  { %p733_p4 = pnand %p731_p3, %p728_p2 }
  0x9b   :  { %736 = shalt.err (!%p733_p4)
}
  0x9c   :  { %s748_s30 = smov 128   ;;  %s749_s3 = smov 8  }
  0x9d   :  { %574 = dma.vmem_to_hbm [thread:$0]  %s569_s22, 1024, %s1166_s2, [#allocation4], %s748_s30, %s748_s30, %s749_s3  }
  0x9e   :  { %741 = dma.done.wait [#allocation4], 1024  }
  0x9f   :  { %742 = vsyncadd [#allocation4], 4294966272 }
  0xa0   :  { %578 = vsyncpa [#allocation3], 1 }
  0xa1   :  { %579 = vsyncpa [#allocation4], 1 }
  0xa2   :  { %580 = vsyncpa [#allocation5], 1 }

</bundles_post_ra>
